<compile_context>
chip_gen: v5e
topology: v5e:2x2
jax: 0.10.0
libtpu: 0.0.40
codegen_flags: <defaults>
</compile_context>

<pallas_src>
import functools

import jax
import jax.numpy as jnp
from jax.experimental import pallas as pl
from jax.experimental.pallas import tpu as pltpu


# ----------------------------------------------------------------------------
# Counter-based hash PRNG (shared by the kernel and the pure-JAX reference)
# ----------------------------------------------------------------------------
def _hash_mix(h):
    h = h ^ (h >> 16)
    h = h * jnp.uint32(0x7FEB352D)
    h = h ^ (h >> 15)
    h = h * jnp.uint32(0x846CA68B)
    h = h ^ (h >> 16)
    return h


def _keep_mask(row_u32, col_u32, n_cols, seed_u32, p):
    """Boolean keep-mask for inverted dropout.

    Depends only on the global element position (row, col) and the seed, so it
    is invariant to how the array is tiled (required because x tiles are
    re-read once per N-tile)."""
    idx = row_u32 * jnp.uint32(n_cols) + col_u32
    h = idx * jnp.uint32(0x9E3779B1) + seed_u32 * jnp.uint32(0x85EBCA77)
    h = _hash_mix(h)
    threshold = jnp.uint32(min(int(round(p * 4294967296.0)), 4294967295))
    return h >= threshold            # keep with probability ~ (1 - p)


# ----------------------------------------------------------------------------
# Fused (dropout) + Linear + bias + ReLU kernel
# ----------------------------------------------------------------------------
def _fused_layer_kernel(seed_ref, x_ref, w_ref, b_ref, o_ref, *,
                        apply_dropout, p, k_total, tm, tk):
    i = pl.program_id(0)       # M tile (parallel)
    kk = pl.program_id(2)      # K tile (reduction, innermost)
    nk = pl.num_programs(2)

    x = x_ref[...]
    if apply_dropout:
        # dropout mask hashed from the global (row, col) position + seed
        row = jax.lax.broadcasted_iota(jnp.int32, x.shape, 0) + i * tm
        col = jax.lax.broadcasted_iota(jnp.int32, x.shape, 1) + kk * tk
        keep = _keep_mask(row.astype(jnp.uint32), col.astype(jnp.uint32),
                          k_total, seed_ref[0].astype(jnp.uint32), p)
        scale = jnp.float32(1.0 / (1.0 - p))
        x = jnp.where(keep, x * scale, jnp.zeros_like(x))

    # accumulate directly into the (resident, f32) output block
    @pl.when(kk == 0)
    def _():
        o_ref[...] = jnp.zeros_like(o_ref)

    o_ref[...] += jnp.dot(x, w_ref[...], preferred_element_type=jnp.float32)

    # epilogue: bias + ReLU once the K reduction is complete
    @pl.when(kk == nk - 1)
    def _():
        o_ref[...] = jnp.maximum(o_ref[...] + b_ref[...], 0.0).astype(o_ref.dtype)


def _pick_tile(dim, desired, align):
    """Largest aligned tile <= desired that divides dim, else the full dim."""
    if dim <= desired:
        return dim
    t = (desired // align) * align
    while t >= align:
        if dim % t == 0:
            return t
        t -= align
    return dim


def fused_dropout_linear_relu(x, w, b, *, p=0.5, apply_dropout=False, seed=0,
                              tm=256, tn=256, tk=512):
    """y = relu(dropout(x) @ w + b), with dropout fused into the matmul."""
    m, k_dim = x.shape
    kw, n = w.shape
    assert kw == k_dim
    tm = _pick_tile(m, tm, 8)
    tn = _pick_tile(n, tn, 128)
    tk = _pick_tile(k_dim, tk, 128)
    grid = (m // tm, n // tn, k_dim // tk)
    b2d = b.reshape(1, n)
    seed_arr = jnp.asarray([seed], dtype=jnp.int32)

    kernel = functools.partial(
        _fused_layer_kernel, apply_dropout=apply_dropout, p=float(p),
        k_total=k_dim, tm=tm, tk=tk)

    return pl.pallas_call(
        kernel,
        out_shape=jax.ShapeDtypeStruct((m, n), x.dtype),
        grid=grid,
        in_specs=[
            pl.BlockSpec(memory_space=pltpu.MemorySpace.SMEM),        # seed
            pl.BlockSpec((tm, tk), lambda i, j, kk: (i, kk)),          # x
            pl.BlockSpec((tk, tn), lambda i, j, kk: (kk, j)),          # w
            pl.BlockSpec((1, tn), lambda i, j, kk: (0, j)),            # bias
        ],
        out_specs=pl.BlockSpec((tm, tn), lambda i, j, kk: (i, j)),
        compiler_params=pltpu.CompilerParams(
            dimension_semantics=("parallel", "parallel", "arbitrary")),
    )(seed_arr, x, w, b2d)


# ----------------------------------------------------------------------------
# DenseNet init / forward
# ----------------------------------------------------------------------------
def densenet_init(key, input_flat_size, out_hidden_size, last_feat_dim):
    k1, k2, k3, k4 = jax.random.split(key, 4)
    scale1 = 1.0 / jnp.sqrt(input_flat_size)
    scale2 = 1.0 / jnp.sqrt(last_feat_dim)
    return {
        # stored (in, out)  ==  torch weight (out, in) transposed
        "w1": jax.random.uniform(
            k1, (input_flat_size, last_feat_dim), jnp.float32, -scale1, scale1),
        "b1": jax.random.uniform(
            k2, (last_feat_dim,), jnp.float32, -scale1, scale1),
        "w2": jax.random.uniform(
            k3, (last_feat_dim, out_hidden_size), jnp.float32, -scale2, scale2),
        "b2": jax.random.uniform(
            k4, (out_hidden_size,), jnp.float32, -scale2, scale2),
    }


def densenet_forward(params, x, *, p_dropout=0.5, training=True, seed=0):
    b = x.shape[0]
    flat = x.reshape(b, -1)                     # torch: tensor_x.view(B, -1)
    use_drop = bool(training) and p_dropout > 0.0
    if use_drop:
        assert p_dropout < 1.0, "p_dropout=1.0 would divide by zero"
    h = fused_dropout_linear_relu(flat, params["w1"], params["b1"],
                                  p=p_dropout, apply_dropout=use_drop, seed=seed)
    h = fused_dropout_linear_relu(h, params["w2"], params["b2"],
                                  p=p_dropout, apply_dropout=use_drop,
                                  seed=seed + 1)
    return h


# ----------------------------------------------------------------------------
# Pure-JAX reference (same hash-PRNG dropout) for correctness checks
# ----------------------------------------------------------------------------
def _dropout_ref(x2d, seed, p):
    m, k = x2d.shape
    row = jnp.arange(m, dtype=jnp.uint32)[:, None]
    col = jnp.arange(k, dtype=jnp.uint32)[None, :]
    keep = _keep_mask(row, col, k, jnp.uint32(seed), p)
    return jnp.where(keep, x2d * jnp.float32(1.0 / (1.0 - p)), 0.0)


def _reference_forward(params, x, *, p, training, seed):
    flat = x.reshape(x.shape[0], -1)
    h = flat
    if training and p > 0.0:
        h = _dropout_ref(h, seed, p)
    h = jnp.maximum(h @ params["w1"] + params["b1"], 0.0)
    if training and p > 0.0:
        h = _dropout_ref(h, seed + 1, p)
    h = jnp.maximum(h @ params["w2"] + params["b2"], 0.0)
    return h


if __name__ == "__main__":
    key = jax.random.PRNGKey(0)
    kx, kp = jax.random.split(key)

    # small shapes: batch=2, channels=4, spatial=16x16 -> flat 1024
    B, C, H, W = 2, 4, 16, 16
    input_flat_size = C * H * W          # 1024
    last_feat_dim = 256                  # (module default 4096, shrunk for demo)
    out_hidden_size = 128                # (module default 1024, shrunk for demo)

    x = jax.random.normal(kx, (B, C, H, W), dtype=jnp.float32)
    params = densenet_init(kp, input_flat_size, out_hidden_size, last_feat_dim)

    # train mode (dropout fused into the matmul kernels)
    out_train = jax.block_until_ready(
        densenet_forward(params, x, p_dropout=0.5, training=True, seed=42))
    assert out_train.shape == (B, out_hidden_size), out_train.shape
    assert bool(jnp.all(out_train >= 0.0))
    assert bool(jnp.all(jnp.isfinite(out_train)))
    ref_train = _reference_forward(params, x, p=0.5, training=True, seed=42)
    assert jnp.allclose(out_train, ref_train, atol=1e-4, rtol=1e-4)

    # eval mode (dropout = identity)
    out_eval = jax.block_until_ready(
        densenet_forward(params, x, p_dropout=0.5, training=False))
    ref_eval = _reference_forward(params, x, p=0.5, training=False, seed=0)
    assert jnp.allclose(out_eval, ref_eval, atol=1e-4, rtol=1e-4)

    print("KERNEL_OK")
</pallas_src>

<mosaic_0001>
module attributes {stable_mosaic.version = 11 : i64} {
  func.func @_fused_layer_kernel(%arg0: i32, %arg1: i32, %arg2: i32, %arg3: memref<1xi32, #tpu.memory_space<smem>>, %arg4: memref<2x512xf32, #tpu.memory_space<vmem>>, %arg5: memref<512x256xf32, #tpu.memory_space<vmem>>, %arg6: memref<1x256xf32, #tpu.memory_space<vmem>>, %arg7: memref<2x256xf32, #tpu.memory_space<vmem>>) attributes {dimension_semantics = [#tpu.dimension_semantics<parallel>, #tpu.dimension_semantics<parallel>, #tpu.dimension_semantics<arbitrary>], iteration_bounds = array<i64: 1, 1, 2>, scalar_prefetch = 0 : i64, scratch_operands = 0 : i64, tpu.core_type = #tpu.core_type<tc>, window_params = [{transform_indices = @transform_0, window_bounds = array<i64: 1>}, {transform_indices = @transform_1, window_bounds = array<i64: 2, 512>}, {transform_indices = @transform_2, window_bounds = array<i64: 512, 256>}, {transform_indices = @transform_3, window_bounds = array<i64: 1, 256>}, {transform_indices = @transform_4, window_bounds = array<i64: 2, 256>}]} {
    %c0 = arith.constant 0 : index
    %c0_0 = arith.constant 0 : index
    %0 = vector.load %arg4[%c0, %c0_0] : memref<2x512xf32, #tpu.memory_space<vmem>>, vector<2x512xf32>
    %1 = tpu.iota {dimensions = array<i32: 0>} : vector<2x512xi32>
    %c2_i32 = arith.constant 2 : i32
    %2 = arith.muli %arg0, %c2_i32 : i32
    %3 = vector.broadcast %2 : i32 to vector<2x512xi32>
    %4 = arith.addi %1, %3 : vector<2x512xi32>
    %5 = tpu.iota {dimensions = array<i32: 1>} : vector<2x512xi32>
    %c512_i32 = arith.constant 512 : i32
    %6 = arith.muli %arg2, %c512_i32 : i32
    %7 = vector.broadcast %6 : i32 to vector<2x512xi32>
    %8 = arith.addi %5, %7 : vector<2x512xi32>
    %c0_1 = arith.constant 0 : index
    %9 = memref.load %arg3[%c0_1] : memref<1xi32, #tpu.memory_space<smem>>
    %c1024_i32 = arith.constant 1024 : i32
    %10 = vector.broadcast %c1024_i32 : i32 to vector<2x512xi32>
    %11 = arith.muli %4, %10 : vector<2x512xi32>
    %12 = arith.addi %11, %8 : vector<2x512xi32>
    %c-1640531535_i32 = arith.constant -1640531535 : i32
    %13 = vector.broadcast %c-1640531535_i32 : i32 to vector<2x512xi32>
    %14 = arith.muli %12, %13 : vector<2x512xi32>
    %c-2048144777_i32 = arith.constant -2048144777 : i32
    %15 = arith.muli %9, %c-2048144777_i32 : i32
    %16 = vector.broadcast %15 : i32 to vector<2x512xi32>
    %17 = arith.addi %14, %16 : vector<2x512xi32>
    %c16_i32 = arith.constant 16 : i32
    %18 = vector.broadcast %c16_i32 : i32 to vector<2x512xi32>
    %19 = arith.shrui %17, %18 : vector<2x512xi32>
    %20 = arith.xori %17, %19 : vector<2x512xi32>
    %c2146121005_i32 = arith.constant 2146121005 : i32
    %21 = vector.broadcast %c2146121005_i32 : i32 to vector<2x512xi32>
    %22 = arith.muli %20, %21 : vector<2x512xi32>
    %c15_i32 = arith.constant 15 : i32
    %23 = vector.broadcast %c15_i32 : i32 to vector<2x512xi32>
    %24 = arith.shrui %22, %23 : vector<2x512xi32>
    %25 = arith.xori %22, %24 : vector<2x512xi32>
    %c-2073254261_i32 = arith.constant -2073254261 : i32
    %26 = vector.broadcast %c-2073254261_i32 : i32 to vector<2x512xi32>
    %27 = arith.muli %25, %26 : vector<2x512xi32>
    %c16_i32_2 = arith.constant 16 : i32
    %28 = vector.broadcast %c16_i32_2 : i32 to vector<2x512xi32>
    %29 = arith.shrui %27, %28 : vector<2x512xi32>
    %30 = arith.xori %27, %29 : vector<2x512xi32>
    %c-2147483648_i32 = arith.constant -2147483648 : i32
    %31 = vector.broadcast %c-2147483648_i32 : i32 to vector<2x512xi32>
    %32 = arith.cmpi uge, %30, %31 : vector<2x512xi32>
    %cst = arith.constant 2.000000e+00 : f32
    %33 = vector.broadcast %cst : f32 to vector<2x512xf32>
    %34 = arith.mulf %0, %33 : vector<2x512xf32>
    %cst_3 = arith.constant 0.000000e+00 : f32
    %35 = vector.broadcast %cst_3 : f32 to vector<2x512xf32>
    %36 = arith.select %32, %34, %35 : vector<2x512xi1>, vector<2x512xf32>
    %c0_i32 = arith.constant 0 : i32
    %37 = arith.cmpi eq, %arg2, %c0_i32 : i32
    %38 = arith.extui %37 : i1 to i32
    %c0_i32_4 = arith.constant 0 : i32
    %39 = arith.cmpi ne, %38, %c0_i32_4 : i32
    scf.if %39 {
      %cst_13 = arith.constant 0.000000e+00 : f32
      %48 = vector.broadcast %cst_13 : f32 to vector<2x256xf32>
      %c0_14 = arith.constant 0 : index
      %c0_15 = arith.constant 0 : index
      %49 = vector.load %arg7[%c0_14, %c0_15] : memref<2x256xf32, #tpu.memory_space<vmem>>, vector<2x256xf32>
      tpu.vector_store %arg7[%c0_14, %c0_15], %48 {strides = array<i32>} : memref<2x256xf32, #tpu.memory_space<vmem>>, vector<2x256xf32>,
    } else {
    }
    %c0_5 = arith.constant 0 : index
    %c0_6 = arith.constant 0 : index
    %40 = vector.load %arg7[%c0_5, %c0_6] : memref<2x256xf32, #tpu.memory_space<vmem>>, vector<2x256xf32>
    %c0_7 = arith.constant 0 : index
    %c0_8 = arith.constant 0 : index
    %41 = vector.load %arg5[%c0_7, %c0_8] : memref<512x256xf32, #tpu.memory_space<vmem>>, vector<512x256xf32>
    %cst_9 = arith.constant dense<0.000000e+00> : vector<2x256xf32>
    %42 = tpu.matmul %36, %41, %cst_9 {dimension_numbers = #tpu.dot_dimension_numbers<[1], [0], [0], [1], [0, 0, 1, 1], [], []>} : vector<2x512xf32>, vector<512x256xf32>, vector<2x256xf32> -> vector<2x256xf32>
    %43 = arith.addf %40, %42 : vector<2x256xf32>
    %c0_10 = arith.constant 0 : index
    %c0_11 = arith.constant 0 : index
    %44 = vector.load %arg7[%c0_10, %c0_11] : memref<2x256xf32, #tpu.memory_space<vmem>>, vector<2x256xf32>
    tpu.vector_store %arg7[%c0_10, %c0_11], %43 {strides = array<i32>} : memref<2x256xf32, #tpu.memory_space<vmem>>, vector<2x256xf32>,
    %c1_i32 = arith.constant 1 : i32
    %45 = arith.cmpi eq, %arg2, %c1_i32 : i32
    %46 = arith.extui %45 : i1 to i32
    %c0_i32_12 = arith.constant 0 : i32
    %47 = arith.cmpi ne, %46, %c0_i32_12 : i32
    scf.if %47 {
      %c0_13 = arith.constant 0 : index
      %c0_14 = arith.constant 0 : index
      %48 = vector.load %arg7[%c0_13, %c0_14] : memref<2x256xf32, #tpu.memory_space<vmem>>, vector<2x256xf32>
      %c0_15 = arith.constant 0 : index
      %c0_16 = arith.constant 0 : index
      %49 = vector.load %arg6[%c0_15, %c0_16] : memref<1x256xf32, #tpu.memory_space<vmem>>, vector<1x256xf32>
      %50 = vector.broadcast %49 : vector<1x256xf32> to vector<2x256xf32>
      %51 = arith.addf %48, %50 : vector<2x256xf32>
      %cst_17 = arith.constant 0.000000e+00 : f32
      %52 = vector.broadcast %cst_17 : f32 to vector<2x256xf32>
      %53 = arith.maximumf %51, %52 : vector<2x256xf32>
      %c0_18 = arith.constant 0 : index
      %c0_19 = arith.constant 0 : index
      %54 = vector.load %arg7[%c0_18, %c0_19] : memref<2x256xf32, #tpu.memory_space<vmem>>, vector<2x256xf32>
      tpu.vector_store %arg7[%c0_18, %c0_19], %53 {strides = array<i32>} : memref<2x256xf32, #tpu.memory_space<vmem>>, vector<2x256xf32>,
    } else {
    }
    return
  }
  func.func @transform_0(%arg0: i32, %arg1: i32, %arg2: i32) -> i32 {
    %c0_i32 = arith.constant 0 : i32
    %c0_i32_0 = arith.constant 0 : i32
    return %c0_i32 : i32
  }
  func.func @transform_1(%arg0: i32, %arg1: i32, %arg2: i32) -> (i32, i32) {
    %c0_i32 = arith.constant 0 : i32
    return %arg0, %arg2 : i32, i32
  }
  func.func @transform_2(%arg0: i32, %arg1: i32, %arg2: i32) -> (i32, i32) {
    %c0_i32 = arith.constant 0 : i32
    return %arg2, %arg1 : i32, i32
  }
  func.func @transform_3(%arg0: i32, %arg1: i32, %arg2: i32) -> (i32, i32) {
    %c0_i32 = arith.constant 0 : i32
    %c0_i32_0 = arith.constant 0 : i32
    return %c0_i32, %arg1 : i32, i32
  }
  func.func @transform_4(%arg0: i32, %arg1: i32, %arg2: i32) -> (i32, i32) {
    %c0_i32 = arith.constant 0 : i32
    return %arg0, %arg1 : i32, i32
  }
}

</mosaic_0001>

<bundles_post_ra>
// kernel: tpu_custom_call.1
= control target key start
LH: loop header
LB: loop body
LE: loop exit
PB: predicated region body
PF: predicated region fallthrough
CT: control target
= control target key end

     0   :  { %s1418_s0 = inlined_call_operand.<no memory space> [shape: s32[1], index: 0, kind: input, shape index: {}]   ;;  %s1419_s1 = inlined_call_operand.hbm [shape: f32[2,1024], index: 1, kind: input, shape index: {}]   ;;  %s1420_s2 = inlined_call_operand.hbm [shape: f32[1024,256], index: 2, kind: input, shape index: {}]   ;;  %s1421_s3 = inlined_call_operand.vmem [shape: f32[1,256], index: 3, kind: input, shape index: {}]   ;;  %s1422_s4 = inlined_call_operand.hbm [shape: f32[2,256], index: 4, kind: output, shape index: {}]  }
   0x1   :  { %9 = sst [smem:[#allocation2]] %s1418_s0 }
   0x2   :  { %10 = vsyncpa [#allocation4], 0 }
   0x3   :  { %12 = vsyncpa [#allocation4 + $0x1], 0 }
   0x4   :  { %13 = vsyncpa [#allocation7], 0 }
   0x5   :  { %15 = vsyncpa [#allocation7 + $0x1], 0 }
   0x6   :  { %16 = vsyncpa [#allocation5], 0  ;;  %s1122_s17 = smov 0   ;;  %s1124_s18 = smov 0  }
   0x7   :  { %s1126_s19 = smov 0   ;;  %s1128_s20 = smov 0  }
   0x8   :  { %s1130_s21 = smov 0   ;;  %s1132_s22 = smov 0  }
   0x9 LB: > { %s836_s0 = sadd.s32 4294967295, %s1088_s22   ;;  %s34_s23 = sadd.s32 1, %s1084_s21  ;;  %s1088_s22 = sphi %s1132_s22, %s22_s22   ;;  %s1084_s21 = sphi %s1130_s21, %s1438_s21   ;;  %s1080_s20 = sphi %s1128_s20, %s1437_s20   ;;  %s1076_s19 = sphi %s1126_s19, %s1436_s19   ;;  %s1072_s18 = sphi %s1124_s18, %s1435_s18   ;;  %s1068_s17 = sphi %s1122_s17, %s1434_s17  }
   0xa   : > { %p35_p0 = scmp.ge.s32.totalorder %s34_s23, 2  ;;  %s71_s24 = sadd.s32 1, %s1076_s19 }
   0xb   : > { %p78_p1 = scmp.ne.s32.totalorder %s1076_s19, %s1072_s18  ;;  %p79_p2 = scmp.eq.s32.totalorder %s1088_s22, 0 }
   0xc   : > { %s1440_s23 = smov (%p35_p0, %s34_s23), 0  ;;  %p84_p4 = scmp.ne.s32.totalorder %s1072_s18, %s1068_s17 }
   0xd   : > { %p1158_p3 = por %p79_p2, %p78_p1  ;;  %s67_s26 = ssub.s32 %s1084_s21, %s1440_s23 }
   0xe   : > { %p85_p5 = scmp.eq.s32.totalorder %s836_s0, 0  ;;  %p69_p6 = scmp.eq.s32.totalorder %s67_s26, 0 }
   0xf   : > { %p887_p8 = scmp.lt.s32.totalorder %s1088_s22, 2  ;;  %s1176_s29 = sand.u32 1, %s1076_s19  }
  0x10   : > { %p1167_p7 = por %p85_p5, %p84_p4  ;;  %s869_s30 = sshll.u32 %s1084_s21, 3 }
  0x11   : > { %s1173_s28 = scalar_select %p69_p6, %s1076_s19, %s71_s24  }
  0x12   : > { %s840_s5 = sshll.u32 %s1176_s29, 3  ;;  %s212_s8 = scalar_lea.hbm %s1419_s1, %s869_s30 }
  0x13   : > { %s214_s9 = sshll.u32 %s212_s8, 4  ;;  %s205_s10 = scalar_lea.vmem [#allocation3], %s840_s5  ;;  %s215_s9 = int_to_ptr.hbm [resolvable:$true] %s214_s9 }
  0x14   : > { %s216_s11 = sshll.u32 %s205_s10, 4  ;;  %p1185_p9 = pnand %p887_p8, %p1158_p3  ;;  %s217_s11 = int_to_ptr.vmem [resolvable:$true] %s216_s11 }
  0x15   : > { %p847_p10 = scmp.ge.s32.totalorder %s1088_s22, 1  ;;  %p246_p11 = scmp.lt.s32.totalorder %s1088_s22, 3 }
  0x16   : > { %s843_s13 = sshll.u32 %s1176_s29, 10  ;;  %s202_s14 = scalar_lea.sflag [#allocation4], %s1176_s29 }
  0x17   : > { %883 = dma.hbm_to_vmem [thread:$0]  (!%p1185_p9), %s215_s9, 128, %s217_s11, %s202_s14  }
  0x18   : > { %p247_p12 = pnand %p847_p10, %p246_p11  ;;  %s871_s15 = sshll.u32 %s1084_s21, 10 }
  0x19   : > { %s227_s16 = scalar_lea.vmem [#allocation6], %s843_s13  ;;  %s235_s25 = scalar_lea.hbm %s1420_s2, %s871_s15 }
  0x1a   : > { %s238_s17 = sshll.u32 %s227_s16, 4  ;;  %s236_s30 = sshll.u32 %s235_s25, 4  ;;  %s239_s17 = int_to_ptr.vmem [resolvable:$true] %s238_s17  ;;  %s237_s30 = int_to_ptr.hbm [resolvable:$true] %s236_s30 }
  0x1b   : > { %s224_s5 = scalar_lea.sflag [#allocation7], %s1176_s29  ;;  %s1090_s6 = smov 256  }
  0x1c   : > { %s1091_s7 = smov 16   ;;  %250 = sbr.rel (%p247_p12) target bundleno = 298 (0x12a), region = 36 }
  0x1d   : > { %886 = dma.hbm_to_vmem [thread:$0]  (!%p1185_p9), %s237_s30, 16384, %s239_s17, %s224_s5, %s1090_s6, %s1090_s6, %s1091_s7  }
  0x1e   : > { %s252_s8 = sand.u32 (!%p247_p12), 1, %s1072_s18  }
  0x1f   : > { %s848_s9 = sshll.u32 (!%p247_p12), %s252_s8, 3  ;;  %s253_s10 = scalar_lea.sflag (!%p247_p12), [#allocation4], %s252_s8 }
  0x20   : > { %s256_s11 = scalar_lea.vmem (!%p247_p12), [#allocation3], %s848_s9 }
  0x21   : > { %1055 = dma.done.wait (%p1167_p7), %s253_s10, 128  }
  0x22   : > { %1057 = vsyncadd (%p1167_p7), %s253_s10, 4294967168  ;;  %s849_s13 = sshll.u32 %s252_s8, 10  ;;  %s263_s14 = scalar_lea.sflag [#allocation7], %s252_s8 }
  0x23   : > { %s1207_s29 = scalar_lea.vmem [#allocation6], %s849_s13 }
  0x24   : > { %1059 = dma.done.wait (%p1167_p7), %s263_s14, 16384  }
  0x25   : > { %1061 = vsyncadd (%p1167_p7), %s263_s14, 4294950912  ;;  %v306_v0 = vlaneseq  ;;  %s850_s12 = sshll.u32 %s1080_s20, 9  ;;  %s322_s15 = sld [smem:[#allocation2]]  ;;  %v305_v13 = vld [vmem:[%s256_s11] sm:$0xff] }
  0x26   : > { %v317_v1 = vstv %s850_s12  ;;  %v382_v17 = vmul.f32 2.0, %v305_v13  ;;  %p855_p13 = scmp.ne.s32.totalorder %s1080_s20, 0 }
  0x27   : > { %v307_v2 = vshrl.u32 %v306_v0, 7  ;;  %v312_v3 = vand.u32 127, %v306_v0 }
  0x28   : > { %384 = vst [vmem:[#allocation1] ss:$4 sm:$0xff] %v382_v17 }
  0x29   : > { %v313_v4 = vadd.s32 128, %v312_v3  ;;  %v314_v5 = vadd.s32 256, %v312_v3  ;;  %v315_v6 = vadd.s32 384, %v312_v3  ;;  %v318_v7 = vadd.s32 %v317_v1, %v312_v3 }
  0x2a   : > { %v323_v8 = vmul.u32 1024, %v307_v2 }
  0x2b   : > { %v319_v9 = vadd.s32 %v317_v1, %v313_v4  ;;  %v320_v10 = vadd.s32 %v317_v1, %v314_v5  ;;  %v321_v11 = vadd.s32 %v317_v1, %v315_v6  ;;  %s332_s16 = smul.u32 2246822519, %s322_s15 }
  0x2c   : > { %v324_v12 = vadd.s32 %v323_v8, %v318_v7 }
  0x2d   : > { %v325_v14 = vadd.s32 %v323_v8, %v319_v9  ;;  %v326_v15 = vadd.s32 %v323_v8, %v320_v10  ;;  %v327_v16 = vadd.s32 %v323_v8, %v321_v11  ;;  %v333_v19 = vstv %s332_s16 }
  0x2e   : > { %v328_v18 = vmul.u32 2654435761, %v324_v12 }
  0x2f   : > { %v329_v20 = vmul.u32 2654435761, %v325_v14  ;;  %v330_v21 = vmul.u32 2654435761, %v326_v15  ;;  %v331_v22 = vmul.u32 2654435761, %v327_v16 }
  0x30   : > { %v334_v23 = vadd.s32 %v333_v19, %v328_v18  ;;  %v1214_v40 = vld.sshfl [vmem:[#allocation1] sm:$0xff pattern:$0x73625140]  ;;  %v1216_v44 = vld.sshfl [vmem:[#allocation1 + $0x8] sm:$0xff pattern:$0x73625140] }
  0x31   : > { %v335_v24 = vadd.s32 %v333_v19, %v329_v20  ;;  %v336_v25 = vadd.s32 %v333_v19, %v330_v21  ;;  %v337_v26 = vadd.s32 %v333_v19, %v331_v22  ;;  %v1218_v46 = vld.sshfl [vmem:[#allocation1 + $0x10] sm:$0xff pattern:$0x73625140]  ;;  %v1220_v47 = vld.sshfl [vmem:[#allocation1 + $0x18] sm:$0xff pattern:$0x73625140] }
  0x32   : > { %v338_v27 = vshrl.u32 %v334_v23, 16 }
  0x33   : > { %v339_v28 = vshrl.u32 %v335_v24, 16  ;;  %v340_v29 = vshrl.u32 %v336_v25, 16  ;;  %v341_v30 = vshrl.u32 %v337_v26, 16 }
  0x34   : > { %v342_v31 = vxor.u32 %v338_v27, %v334_v23 }
  0x35   : > { %v343_v32 = vxor.u32 %v339_v28, %v335_v24  ;;  %v344_v33 = vxor.u32 %v340_v29, %v336_v25  ;;  %v345_v34 = vxor.u32 %v341_v30, %v337_v26 }
  0x36   : > { %v346_v35 = vmul.u32 2146121005, %v342_v31 }
  0x37   : > { %v347_v36 = vmul.u32 2146121005, %v343_v32  ;;  %v348_v37 = vmul.u32 2146121005, %v344_v33  ;;  %v349_v38 = vmul.u32 2146121005, %v345_v34 }
  0x38   : > { %v350_v39 = vshrl.u32 %v346_v35, 15 }
  0x39   : > { %v351_v41 = vshrl.u32 %v347_v36, 15  ;;  %v352_v42 = vshrl.u32 %v348_v37, 15  ;;  %v353_v43 = vshrl.u32 %v349_v38, 15 }
  0x3a   : > { %v354_v45 = vxor.u32 %v350_v39, %v346_v35 }
  0x3b   : > { %v355_v48 = vxor.u32 %v351_v41, %v347_v36  ;;  %v356_v49 = vxor.u32 %v352_v42, %v348_v37  ;;  %v357_v50 = vxor.u32 %v353_v43, %v349_v38 }
  0x3c   : > { %v358_v51 = vmul.u32 2221713035, %v354_v45 }
  0x3d   : > { %v359_v52 = vmul.u32 2221713035, %v355_v48  ;;  %v360_v53 = vmul.u32 2221713035, %v356_v49  ;;  %v361_v54 = vmul.u32 2221713035, %v357_v50 }
  0x3e   : > { %v362_v55 = vshrl.u32 %v358_v51, 16 }
  0x3f   : > { %v363_v56 = vshrl.u32 %v359_v52, 16  ;;  %v364_v57 = vshrl.u32 %v360_v53, 16  ;;  %v365_v58 = vshrl.u32 %v361_v54, 16 }
  0x40   : > { %v366_v59 = vxor.u32 %v362_v55, %v358_v51 }
  0x41   : > { %v367_v60 = vxor.u32 %v363_v56, %v359_v52  ;;  %v368_v61 = vxor.u32 %v364_v57, %v360_v53  ;;  %v369_v62 = vxor.u32 %v365_v58, %v361_v54  ;;  %400 = sbr.rel (%p855_p13) target bundleno = 72 (0x48), region = 48 }
  0x42   : > { %v851_v63 = vxor.u32 2147483648, %v366_v59 }
  0x43   : > { %v852_v0 = vxor.u32 2147483648, %v367_v60  ;;  %v853_v1 = vxor.u32 2147483648, %v368_v61  ;;  %v854_v2 = vxor.u32 2147483648, %v369_v62 }
  0x44   : > { %vm1222_vm0 = vcmp.ge.s32.totalorder %v851_v63, 0 }
  0x45   : > { %vm1226_vm1 = vcmp.ge.s32.totalorder %v852_v0, 0  ;;  %vm1230_vm2 = vcmp.ge.s32.totalorder %v853_v1, 0  ;;  %vm1234_vm3 = vcmp.ge.s32.totalorder %v854_v2, 0 }
  0x46   : > { %v1092_v7 = vmov 0.0  }
  0x47   : > { %401 = vst [vmem:[#allocation8] sm:$0xf] %v1092_v7 }
  0x48 PF: > { %v497_v8 = vld [vmem:[%s1207_s29 + $0x2f0] sm:$0xff]  ;;  %v495_v9 = vld [vmem:[%s1207_s29 + $0x2e0] sm:$0xff]  ;;  %vm694_vm4 = vcmask 1041408   ;;  %p864_p0 = scmp.ne.s32.totalorder %s1080_s20, 1 }
  0x49   : > { %v529_v10 = vld [vmem:[%s1207_s29 + $0x3f0] sm:$0xff]  ;;  %571 = vmatpush.msra.mxu2 %v497_v8  ;;  %v527_v14 = vld [vmem:[%s1207_s29 + $0x3e0] sm:$0xff] }
  0x4a   : > { %591 = vmatpush.msra.mxu3 %v529_v10  ;;  %v433_v11 = vld [vmem:[%s1207_s29 + $0xf0] sm:$0xff]  ;;  %v431_v15 = vld [vmem:[%s1207_s29 + $0xe0] sm:$0xff] }
  0x4b   : > { %v465_v12 = vld [vmem:[%s1207_s29 + $0x1f0] sm:$0xff]  ;;  %531 = vmatpush.msra.mxu0 %v433_v11  ;;  %v463_v16 = vld [vmem:[%s1207_s29 + $0x1e0] sm:$0xff]  ;;  %572 = vmatpush.msra.mxu2 %v495_v9 }
  0x4c   : > { %v493_v13 = vld [vmem:[%s1207_s29 + $0x2d0] sm:$0xff]  ;;  %551 = vmatpush.msra.mxu1 %v465_v12  ;;  %592 = vmatpush.msra.mxu3 %v527_v14  ;;  %v491_v19 = vld [vmem:[%s1207_s29 + $0x2c0] sm:$0xff]  ;;  %v498_v14 = vld [vmem:[%s1207_s29 + $0x2f8] sm:$0xff] }
  0x4d   : > { %v525_v17 = vld [vmem:[%s1207_s29 + $0x3d0] sm:$0xff]  ;;  %532 = vmatpush.msra.mxu0 %v431_v15  ;;  %v523_v21 = vld [vmem:[%s1207_s29 + $0x3c0] sm:$0xff]  ;;  %573 = vmatpush.msra.mxu2 %v493_v13  ;;  %v530_v15 = vld [vmem:[%s1207_s29 + $0x3f8] sm:$0xff] }
  0x4e   : > { %v429_v18 = vld [vmem:[%s1207_s29 + $0xd0] sm:$0xff]  ;;  %552 = vmatpush.msra.mxu1 %v463_v16  ;;  %593 = vmatpush.msra.mxu3 %v525_v17  ;;  %v427_v22 = vld [vmem:[%s1207_s29 + $0xc0] sm:$0xff] }
  0x4f   : > { %v461_v20 = vld [vmem:[%s1207_s29 + $0x1d0] sm:$0xff]  ;;  %v459_v23 = vld [vmem:[%s1207_s29 + $0x1c0] sm:$0xff]  ;;  %533 = vmatpush.msra.mxu0 %v429_v18  ;;  %574 = vmatpush.msra.mxu2 %v491_v19  ;;  %v496_v18 = vld [vmem:[%s1207_s29 + $0x2e8] sm:$0xff] }
  0x50   : > { %553 = vmatpush.msra.mxu1 %v461_v20  ;;  %v489_v24 = vld [vmem:[%s1207_s29 + $0x2b0] sm:$0xff]  ;;  %594 = vmatpush.msra.mxu3 %v523_v21  ;;  %v487_v28 = vld [vmem:[%s1207_s29 + $0x2a0] sm:$0xff]  ;;  %v434_v19 = vld [vmem:[%s1207_s29 + $0xf8] sm:$0xff] }
  0x51   : > { %v521_v25 = vld [vmem:[%s1207_s29 + $0x3b0] sm:$0xff]  ;;  %534 = vmatpush.msra.mxu0 %v427_v22  ;;  %v519_v29 = vld [vmem:[%s1207_s29 + $0x3a0] sm:$0xff]  ;;  %575 = vmatpush.msra.mxu2 %v489_v24  ;;  %v466_v20 = vld [vmem:[%s1207_s29 + $0x1f8] sm:$0xff] }
  0x52   : > { %v425_v26 = vld [vmem:[%s1207_s29 + $0xb0] sm:$0xff]  ;;  %554 = vmatpush.msra.mxu1 %v459_v23  ;;  %595 = vmatpush.msra.mxu3 %v521_v25  ;;  %v423_v30 = vld [vmem:[%s1207_s29 + $0xa0] sm:$0xff]  ;;  %v528_v21 = vld [vmem:[%s1207_s29 + $0x3e8] sm:$0xff] }
  0x53   : > { %v457_v27 = vld [vmem:[%s1207_s29 + $0x1b0] sm:$0xff]  ;;  %v455_v31 = vld [vmem:[%s1207_s29 + $0x1a0] sm:$0xff]  ;;  %535 = vmatpush.msra.mxu0 %v425_v26  ;;  %576 = vmatpush.msra.mxu2 %v487_v28  ;;  %v494_v22 = vld [vmem:[%s1207_s29 + $0x2d8] sm:$0xff] }
  0x54   : > { %555 = vmatpush.msra.mxu1 %v457_v27  ;;  %v485_v32 = vld [vmem:[%s1207_s29 + $0x290] sm:$0xff]  ;;  %596 = vmatpush.msra.mxu3 %v519_v29  ;;  %v483_v36 = vld [vmem:[%s1207_s29 + $0x280] sm:$0xff]  ;;  %v432_v23 = vld [vmem:[%s1207_s29 + $0xe8] sm:$0xff] }
  0x55   : > { %v517_v33 = vld [vmem:[%s1207_s29 + $0x390] sm:$0xff]  ;;  %536 = vmatpush.msra.mxu0 %v423_v30  ;;  %v515_v37 = vld [vmem:[%s1207_s29 + $0x380] sm:$0xff]  ;;  %577 = vmatpush.msra.mxu2 %v485_v32  ;;  %v464_v24 = vld [vmem:[%s1207_s29 + $0x1e8] sm:$0xff] }
  0x56   : > { %v421_v34 = vld [vmem:[%s1207_s29 + $0x90] sm:$0xff]  ;;  %556 = vmatpush.msra.mxu1 %v455_v31  ;;  %597 = vmatpush.msra.mxu3 %v517_v33  ;;  %v419_v38 = vld [vmem:[%s1207_s29 + $0x80] sm:$0xff]  ;;  %v526_v25 = vld [vmem:[%s1207_s29 + $0x3d8] sm:$0xff] }
  0x57   : > { %v453_v35 = vld [vmem:[%s1207_s29 + $0x190] sm:$0xff]  ;;  %v451_v39 = vld [vmem:[%s1207_s29 + $0x180] sm:$0xff]  ;;  %537 = vmatpush.msra.mxu0 %v421_v34  ;;  %578 = vmatpush.msra.mxu2 %v483_v36  ;;  %v492_v26 = vld [vmem:[%s1207_s29 + $0x2c8] sm:$0xff] }
  0x58   : > { %557 = vmatpush.msra.mxu1 %v453_v35  ;;  %v481_v41 = vld [vmem:[%s1207_s29 + $0x270] sm:$0xff]  ;;  %598 = vmatpush.msra.mxu3 %v515_v37  ;;  %v479_v48 = vld [vmem:[%s1207_s29 + $0x260] sm:$0xff]  ;;  %v430_v27 = vld [vmem:[%s1207_s29 + $0xd8] sm:$0xff] }
  0x59   : > { %v513_v42 = vld [vmem:[%s1207_s29 + $0x370] sm:$0xff]  ;;  %538 = vmatpush.msra.mxu0 %v419_v38  ;;  %v511_v49 = vld [vmem:[%s1207_s29 + $0x360] sm:$0xff]  ;;  %579 = vmatpush.msra.mxu2 %v481_v41  ;;  %v462_v28 = vld [vmem:[%s1207_s29 + $0x1d8] sm:$0xff] }
  0x5a   : > { %v417_v43 = vld [vmem:[%s1207_s29 + $0x70] sm:$0xff]  ;;  %558 = vmatpush.msra.mxu1 %v451_v39  ;;  %599 = vmatpush.msra.mxu3 %v513_v42  ;;  %v415_v50 = vld [vmem:[%s1207_s29 + $0x60] sm:$0xff]  ;;  %v524_v29 = vld [vmem:[%s1207_s29 + $0x3c8] sm:$0xff] }
  0x5b   : > { %v449_v45 = vld [vmem:[%s1207_s29 + $0x170] sm:$0xff]  ;;  %v447_v51 = vld [vmem:[%s1207_s29 + $0x160] sm:$0xff]  ;;  %539 = vmatpush.msra.mxu0 %v417_v43  ;;  %580 = vmatpush.msra.mxu2 %v479_v48  ;;  %v490_v30 = vld [vmem:[%s1207_s29 + $0x2b8] sm:$0xff] }
  0x5c   : > { %559 = vmatpush.msra.mxu1 %v449_v45  ;;  %v477_v52 = vld [vmem:[%s1207_s29 + $0x250] sm:$0xff]  ;;  %600 = vmatpush.msra.mxu3 %v511_v49  ;;  %v475_v56 = vld [vmem:[%s1207_s29 + $0x240] sm:$0xff]  ;;  %v428_v31 = vld [vmem:[%s1207_s29 + $0xc8] sm:$0xff] }
  0x5d   : > { %v509_v53 = vld [vmem:[%s1207_s29 + $0x350] sm:$0xff]  ;;  %540 = vmatpush.msra.mxu0 %v415_v50  ;;  %v507_v57 = vld [vmem:[%s1207_s29 + $0x340] sm:$0xff]  ;;  %581 = vmatpush.msra.mxu2 %v477_v52  ;;  %v460_v32 = vld [vmem:[%s1207_s29 + $0x1c8] sm:$0xff] }
  0x5e   : > { %v413_v54 = vld [vmem:[%s1207_s29 + $0x50] sm:$0xff]  ;;  %560 = vmatpush.msra.mxu1 %v447_v51  ;;  %601 = vmatpush.msra.mxu3 %v509_v53  ;;  %v411_v58 = vld [vmem:[%s1207_s29 + $0x40] sm:$0xff]  ;;  %v522_v33 = vld [vmem:[%s1207_s29 + $0x3b8] sm:$0xff] }
  0x5f   : > { %v445_v55 = vld [vmem:[%s1207_s29 + $0x150] sm:$0xff]  ;;  %v443_v59 = vld [vmem:[%s1207_s29 + $0x140] sm:$0xff]  ;;  %541 = vmatpush.msra.mxu0 %v413_v54  ;;  %582 = vmatpush.msra.mxu2 %v475_v56  ;;  %v488_v34 = vld [vmem:[%s1207_s29 + $0x2a8] sm:$0xff] }
  0x60   : > { %561 = vmatpush.msra.mxu1 %v445_v55  ;;  %v473_v60 = vld [vmem:[%s1207_s29 + $0x230] sm:$0xff]  ;;  %602 = vmatpush.msra.mxu3 %v507_v57  ;;  %v471_v0 = vld [vmem:[%s1207_s29 + $0x220] sm:$0xff]  ;;  %v426_v35 = vld [vmem:[%s1207_s29 + $0xb8] sm:$0xff] }
  0x61   : > { %v505_v61 = vld [vmem:[%s1207_s29 + $0x330] sm:$0xff]  ;;  %542 = vmatpush.msra.mxu0 %v411_v58  ;;  %v503_v1 = vld [vmem:[%s1207_s29 + $0x320] sm:$0xff]  ;;  %583 = vmatpush.msra.mxu2 %v473_v60  ;;  %v458_v36 = vld [vmem:[%s1207_s29 + $0x1b8] sm:$0xff] }
  0x62   : > { %v409_v62 = vld [vmem:[%s1207_s29 + $0x30] sm:$0xff]  ;;  %562 = vmatpush.msra.mxu1 %v443_v59  ;;  %603 = vmatpush.msra.mxu3 %v505_v61  ;;  %v407_v2 = vld [vmem:[%s1207_s29 + $0x20] sm:$0xff]  ;;  %v520_v37 = vld [vmem:[%s1207_s29 + $0x3a8] sm:$0xff] }
  0x63   : > { %v441_v63 = vld [vmem:[%s1207_s29 + $0x130] sm:$0xff]  ;;  %v439_v7 = vld [vmem:[%s1207_s29 + $0x120] sm:$0xff]  ;;  %543 = vmatpush.msra.mxu0 %v409_v62  ;;  %584 = vmatpush.msra.mxu2 %v471_v0  ;;  %v486_v38 = vld [vmem:[%s1207_s29 + $0x298] sm:$0xff] }
  0x64   : > { %563 = vmatpush.msra.mxu1 %v441_v63  ;;  %v469_v8 = vld [vmem:[%s1207_s29 + $0x210] sm:$0xff]  ;;  %604 = vmatpush.msra.mxu3 %v503_v1  ;;  %v467_v12 = vld [vmem:[%s1207_s29 + $0x200] sm:$0xff]  ;;  %v424_v39 = vld [vmem:[%s1207_s29 + $0xa8] sm:$0xff] }
  0x65   : > { %v501_v9 = vld [vmem:[%s1207_s29 + $0x310] sm:$0xff]  ;;  %544 = vmatpush.msra.mxu0 %v407_v2  ;;  %v499_v13 = vld [vmem:[%s1207_s29 + $0x300] sm:$0xff]  ;;  %585 = vmatpush.msra.mxu2 %v469_v8  ;;  %v456_v41 = vld [vmem:[%s1207_s29 + $0x1a8] sm:$0xff] }
  0x66   : > { %v405_v10 = vld [vmem:[%s1207_s29 + $0x10] sm:$0xff]  ;;  %564 = vmatpush.msra.mxu1 %v439_v7  ;;  %605 = vmatpush.msra.mxu3 %v501_v9  ;;  %v403_v16 = vld [vmem:[%s1207_s29] sm:$0xff]  ;;  %v518_v42 = vld [vmem:[%s1207_s29 + $0x398] sm:$0xff] }
  0x67   : > { %v437_v11 = vld [vmem:[%s1207_s29 + $0x110] sm:$0xff]  ;;  %545 = vmatpush.msra.mxu0 %v405_v10  ;;  %v435_v17 = vld [vmem:[%s1207_s29 + $0x100] sm:$0xff]  ;;  %586 = vmatpush.msra.mxu2 %v467_v12  ;;  %v484_v43 = vld [vmem:[%s1207_s29 + $0x288] sm:$0xff] }
  0x68   : > { %565 = vmatpush.msra.mxu1 %v437_v11  ;;  %606 = vmatpush.msra.mxu3 %v499_v13  ;;  %v422_v45 = vld [vmem:[%s1207_s29 + $0x98] sm:$0xff]  ;;  %v516_v49 = vld [vmem:[%s1207_s29 + $0x388] sm:$0xff] }
  0x69   : > { %651 = vmatpush.msrb.mxu2 %v498_v14  ;;  %546 = vmatpush.msra.mxu0 %v403_v16  ;;  %v454_v48 = vld [vmem:[%s1207_s29 + $0x198] sm:$0xff]  ;;  %v420_v51 = vld [vmem:[%s1207_s29 + $0x88] sm:$0xff] }
  0x6a   : > { %671 = vmatpush.msrb.mxu3 %v530_v15  ;;  %566 = vmatpush.msra.mxu1 %v435_v17  ;;  %v482_v50 = vld [vmem:[%s1207_s29 + $0x278] sm:$0xff]  ;;  %v452_v52 = vld [vmem:[%s1207_s29 + $0x188] sm:$0xff] }
  0x6b   : > { %652 = vmatpush.msrb.mxu2 %v496_v18  ;;  %611 = vmatpush.msrb.mxu0 %v434_v19  ;;  %v514_v53 = vld [vmem:[%s1207_s29 + $0x378] sm:$0xff]  ;;  %v480_v54 = vld [vmem:[%s1207_s29 + $0x268] sm:$0xff] }
  0x6c   : > { %631 = vmatpush.msrb.mxu1 %v466_v20  ;;  %672 = vmatpush.msrb.mxu3 %v528_v21  ;;  %v418_v55 = vld [vmem:[%s1207_s29 + $0x78] sm:$0xff]  ;;  %v512_v57 = vld [vmem:[%s1207_s29 + $0x368] sm:$0xff] }
  0x6d   : > { %653 = vmatpush.msrb.mxu2 %v494_v22  ;;  %612 = vmatpush.msrb.mxu0 %v432_v23  ;;  %v450_v56 = vld [vmem:[%s1207_s29 + $0x178] sm:$0xff]  ;;  %v416_v59 = vld [vmem:[%s1207_s29 + $0x68] sm:$0xff] }
  0x6e   : > { %632 = vmatpush.msrb.mxu1 %v464_v24  ;;  %673 = vmatpush.msrb.mxu3 %v526_v25  ;;  %v478_v58 = vld [vmem:[%s1207_s29 + $0x258] sm:$0xff]  ;;  %v448_v60 = vld [vmem:[%s1207_s29 + $0x168] sm:$0xff] }
  0x6f   : > { %654 = vmatpush.msrb.mxu2 %v492_v26  ;;  %613 = vmatpush.msrb.mxu0 %v430_v27  ;;  %v510_v61 = vld [vmem:[%s1207_s29 + $0x358] sm:$0xff]  ;;  %v476_v62 = vld [vmem:[%s1207_s29 + $0x248] sm:$0xff] }
  0x70   : > { %633 = vmatpush.msrb.mxu1 %v462_v28  ;;  %674 = vmatpush.msrb.mxu3 %v524_v29  ;;  %v414_v63 = vld [vmem:[%s1207_s29 + $0x58] sm:$0xff]  ;;  %v508_v2 = vld [vmem:[%s1207_s29 + $0x348] sm:$0xff] }
  0x71   : > { %655 = vmatpush.msrb.mxu2 %v490_v30  ;;  %614 = vmatpush.msrb.mxu0 %v428_v31  ;;  %v446_v0 = vld [vmem:[%s1207_s29 + $0x158] sm:$0xff]  ;;  %v412_v7 = vld [vmem:[%s1207_s29 + $0x48] sm:$0xff] }
  0x72   : > { %634 = vmatpush.msrb.mxu1 %v460_v32  ;;  %675 = vmatpush.msrb.mxu3 %v522_v33  ;;  %v474_v1 = vld [vmem:[%s1207_s29 + $0x238] sm:$0xff]  ;;  %v444_v8 = vld [vmem:[%s1207_s29 + $0x148] sm:$0xff] }
  0x73   : > { %656 = vmatpush.msrb.mxu2 %v488_v34  ;;  %615 = vmatpush.msrb.mxu0 %v426_v35  ;;  %v472_v9 = vld [vmem:[%s1207_s29 + $0x228] sm:$0xff]  ;;  %v506_v10 = vld [vmem:[%s1207_s29 + $0x338] sm:$0xff] }
  0x74   : > { %635 = vmatpush.msrb.mxu1 %v458_v36  ;;  %676 = vmatpush.msrb.mxu3 %v520_v37  ;;  %v410_v11 = vld [vmem:[%s1207_s29 + $0x38] sm:$0xff]  ;;  %v504_v14 = vld [vmem:[%s1207_s29 + $0x328] sm:$0xff] }
  0x75   : > { %657 = vmatpush.msrb.mxu2 %v486_v38  ;;  %616 = vmatpush.msrb.mxu0 %v424_v39  ;;  %v442_v12 = vld [vmem:[%s1207_s29 + $0x138] sm:$0xff]  ;;  %v408_v15 = vld [vmem:[%s1207_s29 + $0x28] sm:$0xff] }
  0x76   : > { %636 = vmatpush.msrb.mxu1 %v456_v41  ;;  %677 = vmatpush.msrb.mxu3 %v518_v42  ;;  %v470_v13 = vld [vmem:[%s1207_s29 + $0x218] sm:$0xff]  ;;  %v440_v16 = vld [vmem:[%s1207_s29 + $0x128] sm:$0xff] }
  0x77   : > { %658 = vmatpush.msrb.mxu2 %v484_v43  ;;  %617 = vmatpush.msrb.mxu0 %v422_v45  ;;  %v468_v17 = vld [vmem:[%s1207_s29 + $0x208] sm:$0xff]  ;;  %v502_v18 = vld [vmem:[%s1207_s29 + $0x318] sm:$0xff] }
  0x78   : > { %637 = vmatpush.msrb.mxu1 %v454_v48  ;;  %678 = vmatpush.msrb.mxu3 %v516_v49  ;;  %v406_v19 = vld [vmem:[%s1207_s29 + $0x18] sm:$0xff]  ;;  %v500_v21 = vld [vmem:[%s1207_s29 + $0x308] sm:$0xff] }
  0x79   : > { %659 = vmatpush.msrb.mxu2 %v482_v50  ;;  %618 = vmatpush.msrb.mxu0 %v420_v51  ;;  %v438_v20 = vld [vmem:[%s1207_s29 + $0x118] sm:$0xff]  ;;  %v404_v22 = vld [vmem:[%s1207_s29 + $0x8] sm:$0xff] }
  0x7a   : > { %638 = vmatpush.msrb.mxu1 %v452_v52  ;;  %679 = vmatpush.msrb.mxu3 %v514_v53  ;;  %v436_v23 = vld [vmem:[%s1207_s29 + $0x108] sm:$0xff] }
  0x7b   : > { %660 = vmatpush.msrb.mxu2 %v480_v54  ;;  %619 = vmatpush.msrb.mxu0 %v418_v55 }
  0x7c   : > { %639 = vmatpush.msrb.mxu1 %v450_v56  ;;  %680 = vmatpush.msrb.mxu3 %v512_v57 }
  0x7d   : > { %661 = vmatpush.msrb.mxu2 %v478_v58  ;;  %620 = vmatpush.msrb.mxu0 %v416_v59 }
  0x7e   : > { %640 = vmatpush.msrb.mxu1 %v448_v60  ;;  %681 = vmatpush.msrb.mxu3 %v510_v61 }
  0x7f   : > { %662 = vmatpush.msrb.mxu2 %v476_v62  ;;  %621 = vmatpush.msrb.mxu0 %v414_v63 }
  0x80   : > { %858 = vmatmul.msk.f32.vlgmr.msra.gmra.mxu2 %vm1230_vm2, %v1218_v46  ;;  %641 = vmatpush.msrb.mxu1 %v446_v0 }
  0x81   : > { %663 = vmatpush.msrb.mxu2 %v474_v1  ;;  %682 = vmatpush.msrb.mxu3 %v508_v2 }
  0x82   : > { %859 = vmatmul.msk.f32.vlgmr.msra.gmra.mxu3 %vm1234_vm3, %v1220_v47  ;;  %622 = vmatpush.msrb.mxu0 %v412_v7 }
  0x83   : > { %642 = vmatpush.msrb.mxu1 %v444_v8  ;;  %664 = vmatpush.msrb.mxu2 %v472_v9 }
  0x84   : > { %683 = vmatpush.msrb.mxu3 %v506_v10  ;;  %856 = vmatmul.msk.f32.vlgmr.msra.gmra.mxu0 %vm1222_vm0, %v1214_v40 }
  0x85   : > { %857 = vmatmul.msk.f32.vlgmr.msra.gmra.mxu1 %vm1226_vm1, %v1216_v44  ;;  %623 = vmatpush.msrb.mxu0 %v410_v11 }
  0x86   : > { %643 = vmatpush.msrb.mxu1 %v442_v12  ;;  %665 = vmatpush.msrb.mxu2 %v470_v13 }
  0x87   : > { %684 = vmatpush.msrb.mxu3 %v504_v14  ;;  %624 = vmatpush.msrb.mxu0 %v408_v15 }
  0x88   : > { %644 = vmatpush.msrb.mxu1 %v440_v16  ;;  %666 = vmatpush.msrb.mxu2 %v468_v17 }
  0x89   : > { %685 = vmatpush.msrb.mxu3 %v502_v18  ;;  %862 = vmatmul.msk.f32.vlgmr.msrb.gmra.mxu2 %vm1230_vm2, %v1218_v46 }
  0x8a   : > { %625 = vmatpush.msrb.mxu0 %v406_v19  ;;  %645 = vmatpush.msrb.mxu1 %v438_v20 }
  0x8b   : > { %686 = vmatpush.msrb.mxu3 %v500_v21 }
  0x8c   : > { %863 = vmatmul.msk.f32.vlgmr.msrb.gmra.mxu3 %vm1234_vm3, %v1220_v47  ;;  %626 = vmatpush.msrb.mxu0 %v404_v22 }
  0x8d   : > { %646 = vmatpush.msrb.mxu1 %v436_v23  ;;  %860 = vmatmul.msk.f32.vlgmr.msrb.gmra.mxu0 %vm1222_vm0, %v1214_v40  ;;  %v402_v40 = vld [vmem:[#allocation8] sm:$0xf] }
  0x8e   : > { %861 = vmatmul.msk.f32.vlgmr.msrb.gmra.mxu1 %vm1226_vm1, %v1216_v44 }
 0x101   : > { %v548_v46 = vpop.f32.mrf.mxu0 }
 0x102   : > { %v568_v5 = vpop.f32.mrf.mxu1 }
 0x103   : > { %v588_v24 = vpop.f32.mrf.mxu2  ;;  %v569_v26 = vadd.f32 %v568_v5, %v548_v46 }
 0x105   : > { %v608_v25 = vpop.f32.mrf.mxu3  ;;  %v589_v47 = vadd.f32 %v588_v24, %v569_v26 }
 0x107   : > { %v609_v3 = vadd.f32 %v608_v25, %v589_v47 }
 0x10a   : > { %v628_v27 = vpop.f32.mrf.mxu0 }
 0x10b   : > { %v648_v28 = vpop.f32.mrf.mxu1 }
 0x10c   : > { %v649_v29 = vadd.f32 %v648_v28, %v628_v27  ;;  %v668_v6 = vpop.f32.mrf.mxu2 }
 0x10e   : > { %v669_v30 = vadd.f32 %v668_v6, %v649_v29 }
 0x10f   : > { %v688_v31 = vpop.f32.mrf.mxu3 }
 0x110   : > { %v689_v32 = vadd.f32 %v688_v31, %v669_v30 }
 0x112   : > { %v693_v33 = vrot.slane %v689_v32, 6 }
 0x113   : > { %702 = sbr.rel (%p864_p0) target bundleno = 292 (0x124), region = 52 }
 0x114   : > { %v695_v34 = vsel %vm694_vm4, %v609_v3, %v693_v33 }
 0x115   : > { %v697_v4 = vadd.f32 %v695_v34, %v402_v40 }
 0x117   : > { %698 = vst [vmem:[#allocation8] sm:$0xf] %v697_v4 }
 0x118   : > { %v704_v44 = vld [vmem:[%s1421_s3] sm:$0x3] }
 0x119   : > { %v706_v35 = vperm.slane %v704_v44, 0  ;;  %v707_v36 = vperm.slane %v704_v44, 1 }
 0x11b   : > { %v708_v38 = vrot.slane %v707_v36, 6 }
 0x11d   : > { %v709_v39 = vsel %vm694_vm4, %v706_v35, %v708_v38 }
 0x11e   : > { %v703_v37 = vld [vmem:[#allocation8] sm:$0xf] }
 0x11f   : > { %v711_v41 = vadd.f32 %v709_v39, %v703_v37 }
 0x121   : > { %v712_v42 = vmax.f32 %v711_v41, 0.0 }
 0x123   : > { %713 = vst [vmem:[#allocation8] sm:$0xf] %v712_v42 }
 0x124 PF: > { %p888_p1 = scmp.eq.s32.totalorder %s836_s0, 1  ;;  %s727_s20 = sshll.u32 %s1422_s4, 4  ;;  %s728_s20 = int_to_ptr.hbm [resolvable:$true] %s727_s20 }
 0x125   : > { %s1093_s25 = smov [#allocation8]  }
 0x126   : > { %s725_s30 = sshll.u32 %s1093_s25, 4  ;;  %s726_s30 = int_to_ptr.vmem [resolvable:$true] %s725_s30 }
 0x127   : > { %877 = dma.vmem_to_hbm [thread:$0]  (%p888_p1), %s726_s30, 64, %s728_s20, [#allocation5]  }
 0x128   : > { %1063 = dma.done.wait (%p888_p1), [#allocation5], 64  }
 0x129   : > { %1065 = vsyncadd (%p888_p1), [#allocation5], 4294967232 }
 0x12a PF: > { %s22_s22 = sadd.s32 1, %s1088_s22   ;;  %s1434_s17 = smov %s1072_s18 }
 0x12b   : > { %p19_p2 = scmp.ge.s32.totalorder %s22_s22, 4   ;;  %s1435_s18 = smov %s1076_s19 }
 0x12c   : > { %s1436_s19 = smov %s1173_s28  ;;  %s1437_s20 = smov %s1084_s21 }
 0x12d   : > { %s1438_s21 = smov %s1440_s23  ;;  %21 = sbr.rel (!%p19_p2) target bundleno = 9 (0x9), region = 98 }
 0x132   :  { %741 = vsyncpa [#allocation4], 1 }
 0x133   :  { %743 = vsyncpa [#allocation4 + $0x1], 1 }
 0x134   :  { %744 = vsyncpa [#allocation7], 1 }
 0x135   :  { %746 = vsyncpa [#allocation7 + $0x1], 1 }
 0x136   :  { %747 = vsyncpa [#allocation5], 1 }
 0x137   :  { %749 = vsyncpa [#allocation5 + $0x1], 1 }

</bundles_post_ra>
